<compile_context>
chip_gen: v5e
topology: v5e:2x2
jax: 0.10.0
libtpu: 0.0.40
codegen_flags: <defaults>
</compile_context>

<pallas_src>
import functools

import jax
import jax.numpy as jnp
from jax.experimental import pallas as pl
from jax.experimental.pallas import tpu as pltpu


def _layer_norm_f32(x, gamma, beta, eps=1e-5):
    x = x.astype(jnp.float32)
    mu = jnp.mean(x, axis=-1, keepdims=True)
    var = jnp.mean((x - mu) ** 2, axis=-1, keepdims=True)
    return (x - mu) * jax.lax.rsqrt(var + eps) * gamma + beta


def pair_transition_kernel(
    x_ref,            # (TM, C)  row tile of flattened pair_embed
    g_ref, b_ref,     # (1, C)   z_norm gamma / beta
    w1_ref, b1_ref,   # (C, D), (1, D)   linear_trans_1   (D = C * hidden_dim)
    w2_ref, b2_ref,   # (D, C), (1, C)   linear_trans_2
    out_ref,          # (TM, C)
):
    # LayerNorm over pair_dim (statistics in f32).
    z = _layer_norm_f32(x_ref[...], g_ref[...], b_ref[...])              # (TM, C) f32

    # Linear 1 -> ReLU -> Linear 2, both on the MXU with f32 accumulation.
    h = jnp.dot(z, w1_ref[...], preferred_element_type=jnp.float32) + b1_ref[...]
    h = jnp.maximum(h, 0.0)                                              # ReLU
    y = jnp.dot(h, w2_ref[...], preferred_element_type=jnp.float32) + b2_ref[...]

    out_ref[...] = y.astype(out_ref.dtype)


def _round_up(a, m):
    return -(-a // m) * m


@functools.partial(jax.jit, static_argnames=("block_rows",))
def pair_transition(pair_embed, params, *, block_rows=256):
    orig_shape = pair_embed.shape
    C = orig_shape[-1]
    D = params["w1"].shape[1]

    # Flatten all leading dims to rows; tile over rows.
    x2 = pair_embed.reshape(-1, C)
    R = x2.shape[0]
    tm = int(min(block_rows, _round_up(R, 8)))      # row tile, multiple of 8
    R_pad = _round_up(R, tm)
    if R_pad != R:
        x2 = jnp.pad(x2, ((0, R_pad - R), (0, 0)))
    grid = (R_pad // tm,)

    g, b = params["gz"], params["bz"]               # (1, C)
    w1, b1 = params["w1"], params["b1"]             # (C, D), (1, D)
    w2, b2 = params["w2"], params["b2"]             # (D, C), (1, C)

    row_spec = pl.BlockSpec((tm, C), lambda i: (i, 0))

    def resident(shape):
        # Weights/biases: same block for every grid step -> DMA'd once, stay in VMEM.
        return pl.BlockSpec(shape, lambda i, _n=len(shape): (0,) * _n)

    # Advisory cost estimate for the XLA scheduler.
    flops = 2 * R_pad * C * D * 2 + 10 * R_pad * C
    bytes_accessed = (
        2 * R_pad * C * x2.dtype.itemsize
        + 4 * (w1.size + w2.size + g.size + b.size + b1.size + b2.size)
    )
    cost = pl.CostEstimate(flops=flops, transcendentals=0,
                           bytes_accessed=bytes_accessed)

    # VMEM budget: resident weights + double-buffered in/out tiles + f32 working set.
    weight_bytes = 4 * (w1.size + w2.size + g.size + b.size + b1.size + b2.size)
    tile_bytes = 4 * tm * (3 * C + D)
    vmem_limit = int(min(max(2 * (weight_bytes + 2 * tile_bytes), 4 * 2**20),
                         48 * 2**20))

    out2 = pl.pallas_call(
        pair_transition_kernel,
        out_shape=jax.ShapeDtypeStruct((R_pad, C), pair_embed.dtype),
        grid=grid,
        in_specs=[
            row_spec,
            resident((1, C)), resident((1, C)),
            resident((C, D)), resident((1, D)),
            resident((D, C)), resident((1, C)),
        ],
        out_specs=row_spec,
        compiler_params=pltpu.CompilerParams(
            dimension_semantics=("parallel",),
            vmem_limit_bytes=vmem_limit,
        ),
        cost_estimate=cost,
    )(x2, g, b, w1, b1, w2, b2)

    return out2[:R].reshape(orig_shape)


def make_params(key, pair_dim, hidden_dim):
    C = pair_dim
    D = pair_dim * hidden_dim
    ks = jax.random.split(key, 6)

    def w(k, shape, scale):
        return jax.random.normal(k, shape, jnp.float32) * scale

    return {
        # z_norm (non-trivial gamma/beta so the affine part is exercised)
        "gz": 1.0 + 0.1 * jax.random.normal(ks[0], (1, C), jnp.float32),
        "bz": 0.1 * jax.random.normal(ks[1], (1, C), jnp.float32),
        # linear_trans_1 / linear_trans_2, stored (in_features, out_features)
        "w1": w(ks[2], (C, D), 1.0 / C ** 0.5),
        "b1": 0.02 * jax.random.normal(ks[3], (1, D), jnp.float32),
        "w2": w(ks[4], (D, C), 1.0 / D ** 0.5),
        "b2": 0.02 * jax.random.normal(ks[5], (1, C), jnp.float32),
    }


def reference_forward(x, p):
    """Pure-JAX replica of the PyTorch Pair_Transition forward (for verification)."""
    z = _layer_norm_f32(x, p["gz"][0], p["bz"][0])
    h = jax.nn.relu(z @ p["w1"] + p["b1"][0])
    y = h @ p["w2"] + p["b2"][0]
    return y.astype(x.dtype)


if __name__ == "__main__":
    N = 8             # pair rep is N x N
    PAIR_DIM = 32     # global_config['pair_dim']
    HIDDEN_MULT = 4   # pair_trans_config['hidden_dim']  (intermediate = 32*4 = 128)

    key = jax.random.PRNGKey(0)
    kx, kp = jax.random.split(key)
    pair_embed = jax.random.normal(kx, (N, N, PAIR_DIM), jnp.float32)
    params = make_params(kp, PAIR_DIM, HIDDEN_MULT)

    out = pair_transition(pair_embed, params)
    out = jax.block_until_ready(out)

    ref = reference_forward(pair_embed, params)
    assert out.shape == (N, N, PAIR_DIM)
    err = float(jnp.max(jnp.abs(out - ref)))
    assert jnp.allclose(out, ref, atol=2e-4, rtol=2e-4), err

    print("KERNEL_OK")
</pallas_src>

<mosaic_0001>
module attributes {stable_mosaic.version = 11 : i64} {
  func.func @pair_transition_kernel(%arg0: i32, %arg1: memref<64x32xf32, #tpu.memory_space<vmem>>, %arg2: memref<1x32xf32, #tpu.memory_space<vmem>>, %arg3: memref<1x32xf32, #tpu.memory_space<vmem>>, %arg4: memref<32x128xf32, #tpu.memory_space<vmem>>, %arg5: memref<1x128xf32, #tpu.memory_space<vmem>>, %arg6: memref<128x32xf32, #tpu.memory_space<vmem>>, %arg7: memref<1x32xf32, #tpu.memory_space<vmem>>, %arg8: memref<64x32xf32, #tpu.memory_space<vmem>>) attributes {dimension_semantics = [#tpu.dimension_semantics<parallel>], iteration_bounds = array<i64: 1>, scalar_prefetch = 0 : i64, scratch_operands = 0 : i64, tpu.core_type = #tpu.core_type<tc>, window_params = [{transform_indices = @transform_0, window_bounds = array<i64: 64, 32>}, {pipeline_mode = #tpu.pipeline_mode<synchronous>, transform_indices = @transform_1, window_bounds = array<i64: 1, 32>}, {pipeline_mode = #tpu.pipeline_mode<synchronous>, transform_indices = @transform_2, window_bounds = array<i64: 1, 32>}, {pipeline_mode = #tpu.pipeline_mode<synchronous>, transform_indices = @transform_3, window_bounds = array<i64: 32, 128>}, {pipeline_mode = #tpu.pipeline_mode<synchronous>, transform_indices = @transform_4, window_bounds = array<i64: 1, 128>}, {pipeline_mode = #tpu.pipeline_mode<synchronous>, transform_indices = @transform_5, window_bounds = array<i64: 128, 32>}, {pipeline_mode = #tpu.pipeline_mode<synchronous>, transform_indices = @transform_6, window_bounds = array<i64: 1, 32>}, {transform_indices = @transform_7, window_bounds = array<i64: 64, 32>}]} {
    %c0 = arith.constant 0 : index
    %c0_0 = arith.constant 0 : index
    %0 = vector.load %arg1[%c0, %c0_0] : memref<64x32xf32, #tpu.memory_space<vmem>>, vector<64x32xf32>
    %c0_1 = arith.constant 0 : index
    %c0_2 = arith.constant 0 : index
    %1 = vector.load %arg2[%c0_1, %c0_2] : memref<1x32xf32, #tpu.memory_space<vmem>>, vector<1x32xf32>
    %c0_3 = arith.constant 0 : index
    %c0_4 = arith.constant 0 : index
    %2 = vector.load %arg3[%c0_3, %c0_4] : memref<1x32xf32, #tpu.memory_space<vmem>>, vector<1x32xf32>
    %cst = arith.constant dense<0.000000e+00> : vector<64xf32>
    %3 = vector.multi_reduction <add>, %0, %cst [1] : vector<64x32xf32> to vector<64xf32>
    %4 = vector.shape_cast %3 : vector<64xf32> to vector<64x1xf32>
    %cst_5 = arith.constant 3.200000e+01 : f32
    %5 = vector.broadcast %cst_5 : f32 to vector<64x1xf32>
    %6 = arith.divf %4, %5 : vector<64x1xf32>
    %7 = vector.broadcast %6 : vector<64x1xf32> to vector<64x32xf32>
    %8 = arith.subf %0, %7 : vector<64x32xf32>
    %9 = arith.mulf %8, %8 : vector<64x32xf32>
    %cst_6 = arith.constant dense<0.000000e+00> : vector<64xf32>
    %10 = vector.multi_reduction <add>, %9, %cst_6 [1] : vector<64x32xf32> to vector<64xf32>
    %11 = vector.shape_cast %10 : vector<64xf32> to vector<64x1xf32>
    %cst_7 = arith.constant 3.200000e+01 : f32
    %12 = vector.broadcast %cst_7 : f32 to vector<64x1xf32>
    %13 = arith.divf %11, %12 : vector<64x1xf32>
    %14 = vector.broadcast %6 : vector<64x1xf32> to vector<64x32xf32>
    %15 = arith.subf %0, %14 : vector<64x32xf32>
    %cst_8 = arith.constant 9.99999974E-6 : f32
    %16 = vector.broadcast %cst_8 : f32 to vector<64x1xf32>
    %17 = arith.addf %13, %16 : vector<64x1xf32>
    %18 = math.rsqrt %17 : vector<64x1xf32>
    %19 = vector.broadcast %18 : vector<64x1xf32> to vector<64x32xf32>
    %20 = arith.mulf %15, %19 : vector<64x32xf32>
    %21 = vector.broadcast %1 : vector<1x32xf32> to vector<64x32xf32>
    %22 = arith.mulf %20, %21 : vector<64x32xf32>
    %23 = vector.broadcast %2 : vector<1x32xf32> to vector<64x32xf32>
    %24 = arith.addf %22, %23 : vector<64x32xf32>
    %c0_9 = arith.constant 0 : index
    %c0_10 = arith.constant 0 : index
    %25 = vector.load %arg4[%c0_9, %c0_10] : memref<32x128xf32, #tpu.memory_space<vmem>>, vector<32x128xf32>
    %cst_11 = arith.constant dense<0.000000e+00> : vector<64x128xf32>
    %26 = tpu.matmul %24, %25, %cst_11 {dimension_numbers = #tpu.dot_dimension_numbers<[1], [0], [0], [1], [0, 0, 1, 1], [], []>} : vector<64x32xf32>, vector<32x128xf32>, vector<64x128xf32> -> vector<64x128xf32>
    %c0_12 = arith.constant 0 : index
    %c0_13 = arith.constant 0 : index
    %27 = vector.load %arg5[%c0_12, %c0_13] : memref<1x128xf32, #tpu.memory_space<vmem>>, vector<1x128xf32>
    %28 = vector.broadcast %27 : vector<1x128xf32> to vector<64x128xf32>
    %29 = arith.addf %26, %28 : vector<64x128xf32>
    %cst_14 = arith.constant 0.000000e+00 : f32
    %30 = vector.broadcast %cst_14 : f32 to vector<64x128xf32>
    %31 = arith.maximumf %29, %30 : vector<64x128xf32>
    %c0_15 = arith.constant 0 : index
    %c0_16 = arith.constant 0 : index
    %32 = vector.load %arg6[%c0_15, %c0_16] : memref<128x32xf32, #tpu.memory_space<vmem>>, vector<128x32xf32>
    %cst_17 = arith.constant dense<0.000000e+00> : vector<64x32xf32>
    %33 = tpu.matmul %31, %32, %cst_17 {dimension_numbers = #tpu.dot_dimension_numbers<[1], [0], [0], [1], [0, 0, 1, 1], [], []>} : vector<64x128xf32>, vector<128x32xf32>, vector<64x32xf32> -> vector<64x32xf32>
    %c0_18 = arith.constant 0 : index
    %c0_19 = arith.constant 0 : index
    %34 = vector.load %arg7[%c0_18, %c0_19] : memref<1x32xf32, #tpu.memory_space<vmem>>, vector<1x32xf32>
    %35 = vector.broadcast %34 : vector<1x32xf32> to vector<64x32xf32>
    %36 = arith.addf %33, %35 : vector<64x32xf32>
    %c0_20 = arith.constant 0 : index
    %c0_21 = arith.constant 0 : index
    %37 = vector.load %arg8[%c0_20, %c0_21] : memref<64x32xf32, #tpu.memory_space<vmem>>, vector<64x32xf32>
    tpu.vector_store %arg8[%c0_20, %c0_21], %36 {strides = array<i32>} : memref<64x32xf32, #tpu.memory_space<vmem>>, vector<64x32xf32>,
    return
  }
  func.func @transform_0(%arg0: i32) -> (i32, i32) {
    %c0_i32 = arith.constant 0 : i32
    %c0_i32_0 = arith.constant 0 : i32
    return %arg0, %c0_i32 : i32, i32
  }
  func.func @transform_1(%arg0: i32) -> (i32, i32) {
    %c0_i32 = arith.constant 0 : i32
    %c0_i32_0 = arith.constant 0 : i32
    %c0_i32_1 = arith.constant 0 : i32
    return %c0_i32, %c0_i32_0 : i32, i32
  }
  func.func @transform_2(%arg0: i32) -> (i32, i32) {
    %c0_i32 = arith.constant 0 : i32
    %c0_i32_0 = arith.constant 0 : i32
    %c0_i32_1 = arith.constant 0 : i32
    return %c0_i32, %c0_i32_0 : i32, i32
  }
  func.func @transform_3(%arg0: i32) -> (i32, i32) {
    %c0_i32 = arith.constant 0 : i32
    %c0_i32_0 = arith.constant 0 : i32
    %c0_i32_1 = arith.constant 0 : i32
    return %c0_i32, %c0_i32_0 : i32, i32
  }
  func.func @transform_4(%arg0: i32) -> (i32, i32) {
    %c0_i32 = arith.constant 0 : i32
    %c0_i32_0 = arith.constant 0 : i32
    %c0_i32_1 = arith.constant 0 : i32
    return %c0_i32, %c0_i32_0 : i32, i32
  }
  func.func @transform_5(%arg0: i32) -> (i32, i32) {
    %c0_i32 = arith.constant 0 : i32
    %c0_i32_0 = arith.constant 0 : i32
    %c0_i32_1 = arith.constant 0 : i32
    return %c0_i32, %c0_i32_0 : i32, i32
  }
  func.func @transform_6(%arg0: i32) -> (i32, i32) {
    %c0_i32 = arith.constant 0 : i32
    %c0_i32_0 = arith.constant 0 : i32
    %c0_i32_1 = arith.constant 0 : i32
    return %c0_i32, %c0_i32_0 : i32, i32
  }
  func.func @transform_7(%arg0: i32) -> (i32, i32) {
    %c0_i32 = arith.constant 0 : i32
    %c0_i32_0 = arith.constant 0 : i32
    return %arg0, %c0_i32 : i32, i32
  }
}

</mosaic_0001>

<bundles_post_ra>
// kernel: pair_transition.1
= control target key start
LH: loop header
LB: loop body
LE: loop exit
PB: predicated region body
PF: predicated region fallthrough
CT: control target
= control target key end

     0   :  { %vm37_vm0 = vcmask 261120   ;;  %s861_s0 = inlined_call_operand.vmem [shape: f32[64,32], index: 0, kind: input, shape index: {}]   ;;  %s862_s1 = inlined_call_operand.vmem [shape: f32[1,32], index: 1, kind: input, shape index: {}]   ;;  %s863_s2 = inlined_call_operand.vmem [shape: f32[1,32], index: 2, kind: input, shape index: {}]   ;;  %s864_s3 = inlined_call_operand.vmem [shape: f32[32,128], index: 3, kind: input, shape index: {}]   ;;  %s865_s4 = inlined_call_operand.vmem [shape: f32[1,128], index: 4, kind: input, shape index: {}]   ;;  %s866_s5 = inlined_call_operand.vmem [shape: f32[128,32], index: 5, kind: input, shape index: {}]   ;;  %s867_s6 = inlined_call_operand.vmem [shape: f32[1,32], index: 6, kind: input, shape index: {}]   ;;  %s868_s7 = inlined_call_operand.hbm [shape: f32[64,32], index: 7, kind: output, shape index: {}]  }
   0x1   :  { %v33_v0 = vld [vmem:[%s861_s0 + $0x30] sm:$0xff]  ;;  %v27_v2 = vld [vmem:[%s861_s0] sm:$0xff]  ;;  %v30_v7 = vld [vmem:[%s861_s0 + $0x18] sm:$0xff] }
   0x2   :  { %v29_v1 = vld [vmem:[%s861_s0 + $0x10] sm:$0xff]  ;;  %v56_v3 = vsel %vm37_vm0, %v33_v0, 0.0  ;;  %v38_v5 = vsel %vm37_vm0, %v27_v2, 0.0  ;;  %v31_v6 = vld [vmem:[%s861_s0 + $0x20] sm:$0xff] }
   0x3   :  { %v44_v4 = vsel %vm37_vm0, %v29_v1, 0.0  ;;  %57 = vadd.xlane.f32.xlu2 %v56_v3  ;;  %39 = vadd.xlane.f32.xlu0 %v38_v5 }
   0x4   :  { %45 = vadd.xlane.f32.xlu1 %v44_v4 }
   0x5   :  { %12 = vsyncpa [#allocation3], 0  ;;  %v28_v8 = vld [vmem:[%s861_s0 + $0x8] sm:$0xff]  ;;  %v50_v9 = vsel %vm37_vm0, %v31_v6, 0.0  ;;  %v47_v10 = vsel %vm37_vm0, %v30_v7, 0.0  ;;  %v34_v13 = vld [vmem:[%s861_s0 + $0x38] sm:$0xff] }
   0x6   :  { %v41_v11 = vsel %vm37_vm0, %v28_v8, 0.0  ;;  %v32_v12 = vld [vmem:[%s861_s0 + $0x28] sm:$0xff]  ;;  %v59_v15 = vsel %vm37_vm0, %v34_v13, 0.0  ;;  %v507_v16 = vmov 32.0   ;;  %v246_v63 = vld [vmem:[%s864_s3 + $0x18] sm:$0xff]  ;;  %s399_s12 = sshll.u32 %s868_s7, 4  ;;  %s400_s12 = int_to_ptr.hbm [resolvable:$true] %s399_s12 }
   0x7   :  { %v53_v14 = vsel %vm37_vm0, %v32_v12, 0.0  ;;  %463 = vrcp.f32 %v507_v16  ;;  %287 = vmatpush.msra.mxu0 %v246_v63  ;;  %419 = vmatpush.msra.mxu3 %v246_v63  ;;  %s509_s13 = smov 128   ;;  %s510_s14 = smov 8  }
   0xb   :  { %51 = vadd.xlane.f32.xlu2 %v50_v9  ;;  %42 = vadd.xlane.f32.xlu0 %v41_v11 }
   0xc   :  { %48 = vadd.xlane.f32.xlu1 %v47_v10 }
   0xd   :  { %v464_v17 = vpop.eup %463 }
   0xe   :  { %v63_v18 = vmul.f32 32.0, %v464_v17  ;;  %vm67_vm1 = vweird.f32 %v464_v17 }
  0x10   :  { %v64_v19 = vsub.f32 1.0, %v63_v18 }
  0x12   :  { %v65_v20 = vmul.f32 %v464_v17, %v64_v19 }
  0x13   :  { %60 = vadd.xlane.f32.xlu0 %v59_v15 }
  0x14   :  { %54 = vadd.xlane.f32.xlu1 %v53_v14  ;;  %v66_v21 = vadd.f32 %v464_v17, %v65_v20 }
  0x16   :  { %v583_v22 = vsel %vm67_vm1, %v464_v17, %v66_v21 }
  0x76   :  { %v58_v23 = vpop.xlane.xlu2 %57  ;;  %v40_v26 = vpop.xlane.xlu0 %39 }
  0x77   :  { %v46_v24 = vpop.xlane.xlu1 %45  ;;  %v69_v27 = vmul.f32 %v583_v22, %v40_v26  ;;  %v75_v39 = vmul.f32 %v583_v22, %v58_v23 }
  0x78   :  { %v71_v25 = vmul.f32 %v583_v22, %v46_v24 }
  0x79   :  { %v589_v29 = vsub.f32 %v27_v2, %v69_v27  ;;  %v611_v46 = vsub.f32 %v33_v0, %v75_v39  ;;  %v245_v0 = vld [vmem:[%s864_s3 + $0x10] sm:$0xff]  ;;  %v243_v2 = vld [vmem:[%s864_s3] sm:$0xff] }
  0x7a   :  { %v587_v28 = vsub.f32 %v29_v1, %v71_v25  ;;  %288 = vmatpush.msra.mxu0 %v245_v0  ;;  %420 = vmatpush.msra.mxu3 %v245_v0  ;;  %v244_v1 = vld [vmem:[%s864_s3 + $0x8] sm:$0xff] }
  0x7b   :  { %v85_v31 = vmul.f32 %v589_v29, %v589_v29  ;;  %v91_v55 = vmul.f32 %v611_v46, %v611_v46 }
  0x7c   :  { %v87_v30 = vmul.f32 %v587_v28, %v587_v28  ;;  %289 = vmatpush.msra.mxu0 %v244_v1  ;;  %421 = vmatpush.msra.mxu3 %v244_v1 }
  0x7d   :  { %v93_v35 = vsel %vm37_vm0, %v85_v31, 0.0  ;;  %v111_v58 = vsel %vm37_vm0, %v91_v55, 0.0 }
  0x7e   :  { %v99_v32 = vsel %vm37_vm0, %v87_v30, 0.0  ;;  %v52_v33 = vpop.xlane.xlu2 %51  ;;  %94 = vadd.xlane.f32.xlu2 %v93_v35  ;;  %v43_v38 = vpop.xlane.xlu0 %42  ;;  %290 = vmatpush.msra.mxu0 %v243_v2 }
  0x7f   :  { %100 = vadd.xlane.f32.xlu1 %v99_v32  ;;  %v49_v34 = vpop.xlane.xlu1 %48  ;;  %v73_v36 = vmul.f32 %v583_v22, %v52_v33  ;;  %v70_v40 = vmul.f32 %v583_v22, %v43_v38  ;;  %422 = vmatpush.msra.mxu3 %v243_v2 }
  0x80   :  { %v72_v37 = vmul.f32 %v583_v22, %v49_v34 }
  0x81   :  { %v601_v41 = vsub.f32 %v31_v6, %v73_v36  ;;  %v605_v43 = vsub.f32 %v28_v8, %v70_v40 }
  0x82   :  { %v603_v42 = vsub.f32 %v30_v7, %v72_v37 }
  0x83   :  { %v89_v44 = vmul.f32 %v601_v41, %v601_v41  ;;  %v86_v47 = vmul.f32 %v605_v43, %v605_v43 }
  0x84   :  { %v88_v45 = vmul.f32 %v603_v42, %v603_v42 }
  0x85   :  { %v105_v48 = vsel %vm37_vm0, %v89_v44, 0.0  ;;  %v96_v50 = vsel %vm37_vm0, %v86_v47, 0.0 }
  0x86   :  { %v102_v49 = vsel %vm37_vm0, %v88_v45, 0.0  ;;  %97 = vadd.xlane.f32.xlu0 %v96_v50  ;;  %v61_v52 = vpop.xlane.xlu0 %60  ;;  %v678_v45 = vld [vmem:[%s862_s1] ss:$0 sm:$0xff] }
  0x87   :  { %106 = vadd.xlane.f32.xlu1 %v105_v48  ;;  %v55_v51 = vpop.xlane.xlu1 %54  ;;  %103 = vadd.xlane.f32.xlu2 %v102_v49  ;;  %v76_v53 = vmul.f32 %v583_v22, %v61_v52 }
  0x88   :  { %v74_v54 = vmul.f32 %v583_v22, %v55_v51  ;;  %v685_v51 = vld [vmem:[%s863_s2] ss:$0 sm:$0xff] }
  0x89   :  { %v622_v56 = vsub.f32 %v34_v13, %v76_v53 }
  0x8a   :  { %v624_v57 = vsub.f32 %v32_v12, %v74_v54 }
  0x8b   :  { %v92_v59 = vmul.f32 %v622_v56, %v622_v56 }
  0x8c   :  { %v90_v61 = vmul.f32 %v624_v57, %v624_v57 }
  0x8d   :  { %v114_v60 = vsel %vm37_vm0, %v92_v59, 0.0 }
  0x8e   :  { %112 = vadd.xlane.f32.xlu0 %v111_v58  ;;  %v108_v62 = vsel %vm37_vm0, %v90_v61, 0.0 }
  0x8f   :  { %115 = vadd.xlane.f32.xlu2 %v114_v60 }
  0x96   :  { %109 = vadd.xlane.f32.xlu0 %v108_v62 }
  0xf1   :  { %v95_v5 = vpop.xlane.xlu2 %94 }
  0xf2   :  { %v101_v3 = vpop.xlane.xlu1 %100  ;;  %v117_v6 = vmul.f32 %v95_v5, %v583_v22 }
  0xf3   :  { %v119_v4 = vmul.f32 %v101_v3, %v583_v22 }
  0xf4   :  { %v125_v8 = vadd.f32 1e-05, %v117_v6 }
  0xf5   :  { %v647_v7 = vadd.f32 1e-05, %v119_v4 }
  0xf6   :  { %vm139_vm3 = vweird.f32 %v125_v8 }
  0xf7   :  { %465 = vrsqrt.f32 %v647_v7  ;;  %vm159_vm5 = vweird.f32 %v647_v7 }
  0xf8   :  { %467 = vrsqrt.f32 %v125_v8 }
  0xf9   :  { %v98_v10 = vpop.xlane.xlu0 %97 }
  0xfa   :  { %v104_v9 = vpop.xlane.xlu2 %103  ;;  %v107_v11 = vpop.xlane.xlu1 %106  ;;  %v118_v13 = vmul.f32 %v98_v10, %v583_v22 }
  0xfb   :  { %v120_v12 = vmul.f32 %v104_v9, %v583_v22  ;;  %v121_v20 = vmul.f32 %v107_v11, %v583_v22 }
  0xfc   :  { %v126_v17 = vadd.f32 1e-05, %v118_v13 }
  0xfd   :  { %v652_v14 = vpop.eup %465  ;;  %v654_v16 = vadd.f32 1e-05, %v120_v12  ;;  %v661_v25 = vadd.f32 1e-05, %v121_v20 }
  0xfe   :  { %v468_v15 = vpop.eup %467  ;;  %v154_v18 = vmul.f32 %v652_v14, %v647_v7  ;;  %vm160_vm6 = vweird.f32 %v652_v14  ;;  %vm149_vm8 = vweird.f32 %v126_v17 }
  0xff   :  { %v134_v19 = vmul.f32 %v468_v15, %v125_v8  ;;  %469 = vrsqrt.f32 %v654_v16  ;;  %vm140_vm2 = vweird.f32 %v468_v15  ;;  %vm700_vm9 = vmor %vm159_vm5, %vm160_vm6  ;;  %vm169_vm11 = vweird.f32 %v654_v16 }
 0x100   :  { %471 = vrsqrt.f32 %v126_v17  ;;  %v155_v23 = vmul.f32 %v652_v14, %v154_v18  ;;  %vm141_vm4 = vmor %vm139_vm3, %vm140_vm2  ;;  %vm179_vm5 = vweird.f32 %v661_v25 }
 0x101   :  { %v135_v21 = vmul.f32 %v468_v15, %v134_v19  ;;  %v113_v27 = vpop.xlane.xlu0 %112  ;;  %473 = vrsqrt.f32 %v661_v25 }
 0x102   :  { %v116_v26 = vpop.xlane.xlu2 %115  ;;  %v123_v31 = vmul.f32 %v113_v27, %v583_v22  ;;  %v156_v36 = vmul.f32 0.5, %v155_v23 }
 0x103   :  { %v136_v24 = vmul.f32 0.5, %v135_v21  ;;  %v124_v30 = vmul.f32 %v116_v26, %v583_v22 }
 0x104   :  { %v670_v38 = vadd.f32 1e-05, %v123_v31  ;;  %v157_v48 = vsub.f32 1.5, %v156_v36 }
 0x105   :  { %v137_v32 = vsub.f32 1.5, %v136_v24  ;;  %v665_v33 = vpop.eup %469  ;;  %v667_v34 = vadd.f32 1e-05, %v124_v30 }
 0x106   :  { %v472_v35 = vpop.eup %471  ;;  %v164_v39 = vmul.f32 %v665_v33, %v654_v16  ;;  %v158_v61 = vmul.f32 %v652_v14, %v157_v48  ;;  %vm170_vm12 = vweird.f32 %v665_v33  ;;  %vm199_vm15 = vweird.f32 %v670_v38  ;;  %v338_v16 = vld [vmem:[%s866_s5 + $0x70] sm:$0xff] }
 0x107   :  { %v138_v37 = vmul.f32 %v468_v15, %v137_v32  ;;  %v144_v40 = vmul.f32 %v472_v35, %v126_v17  ;;  %475 = vrsqrt.f32 %v667_v34  ;;  %v689_v55 = vpop.eup %473  ;;  %vm150_vm7 = vweird.f32 %v472_v35  ;;  %vm730_vm2 = vmor %vm169_vm11, %vm170_vm12 }
 0x108   :  { %477 = vrsqrt.f32 %v670_v38  ;;  %v165_v52 = vmul.f32 %v665_v33, %v164_v39  ;;  %v174_v0 = vmul.f32 %v689_v55, %v661_v25  ;;  %vm151_vm10 = vmor %vm149_vm8, %vm150_vm7  ;;  %v162_v9 = vsel %vm700_vm9, %v652_v14, %v158_v61  ;;  %v333_v25 = vld [vmem:[%s866_s5 + $0x48] sm:$0xff] }
 0x109   :  { %v142_v44 = vsel %vm141_vm4, %v468_v15, %v138_v37  ;;  %v145_v47 = vmul.f32 %v472_v35, %v144_v40  ;;  %v110_v49 = vpop.xlane.xlu0 %109  ;;  %vm209_vm13 = vweird.f32 %v667_v34  ;;  %v215_v19 = vmul.f32 %v162_v9, %v587_v28  ;;  %v339_v28 = vld [vmem:[%s866_s5 + $0x78] sm:$0xff]  ;;  %v336_v40 = vld [vmem:[%s866_s5 + $0x60] sm:$0xff]  ;;  %v325_v9 = vld [vmem:[%s866_s5 + $0x8] sm:$0xff] }
 0x10a   :  { %v213_v50 = vmul.f32 %v142_v44, %v589_v29  ;;  %v122_v54 = vmul.f32 %v110_v49, %v583_v22  ;;  %v166_v1 = vmul.f32 0.5, %v165_v52  ;;  %v175_v10 = vmul.f32 %v689_v55, %v174_v0  ;;  %344 = vmatpush.msra.mxu1 %v339_v28  ;;  %424 = vmatpush.msrb.mxu3 %v339_v28 }
 0x10b   :  { %v146_v53 = vmul.f32 0.5, %v145_v47  ;;  %v226_v32 = vmul.f32 %v678_v45, %v215_v19  ;;  %423 = vmatpush.msra.mxu2 %v339_v28  ;;  %vm180_vm6 = vweird.f32 %v689_v55  ;;  %v335_v47 = vld [vmem:[%s866_s5 + $0x58] sm:$0xff] }
 0x10c   :  { %v224_v58 = vmul.f32 %v678_v45, %v213_v50  ;;  %v694_v29 = vadd.f32 1e-05, %v122_v54  ;;  %v167_v11 = vsub.f32 1.5, %v166_v1  ;;  %v176_v20 = vmul.f32 0.5, %v175_v10  ;;  %345 = vmatpush.msra.mxu1 %v338_v16  ;;  %426 = vmatpush.msrb.mxu3 %v338_v16  ;;  %vm778_vm7 = vmor %vm179_vm5, %vm180_vm6  ;;  %v329_v1 = vld [vmem:[%s866_s5 + $0x28] sm:$0xff] }
 0x10d   :  { %v147_v59 = vsub.f32 1.5, %v146_v53  ;;  %v696_v60 = vpop.eup %475  ;;  %425 = vmatpush.msra.mxu2 %v338_v16 }
 0x10e   :  { %v235_v62 = vadd.f32 %v685_v51, %v224_v58  ;;  %v478_v22 = vpop.eup %477  ;;  %v204_v3 = vmul.f32 %v696_v60, %v667_v34  ;;  %479 = vrsqrt.f32 %v694_v29  ;;  %vm210_vm14 = vweird.f32 %v696_v60  ;;  %v337_v34 = vld [vmem:[%s866_s5 + $0x68] sm:$0xff] }
 0x10f   :  { %v148_v2 = vmul.f32 %v472_v35, %v147_v59  ;;  %v194_v4 = vmul.f32 %v478_v22, %v670_v38  ;;  %vm200_vm1 = vweird.f32 %v478_v22  ;;  %v168_v21 = vmul.f32 %v665_v33, %v167_v11  ;;  %vm737_vm3 = vmor %vm209_vm13, %vm210_vm14  ;;  %346 = vmatpush.msra.mxu1 %v337_v34  ;;  %428 = vmatpush.msrb.mxu3 %v337_v34 }
 0x110   :  { %411 = vmatmul.msk.f32.vlgmr.msra.gmra.mxu0 %vm37_vm0, %v235_v62  ;;  %v205_v6 = vmul.f32 %v696_v60, %v204_v3  ;;  %vm201_vm4 = vmor %vm199_vm15, %vm200_vm1  ;;  %427 = vmatpush.msra.mxu2 %v337_v34  ;;  %vm189_vm8 = vweird.f32 %v694_v29  ;;  %v328_v3 = vld [vmem:[%s866_s5 + $0x20] sm:$0xff] }
 0x111   :  { %v152_v5 = vsel %vm151_vm10, %v472_v35, %v148_v2  ;;  %v195_v7 = vmul.f32 %v478_v22, %v194_v4  ;;  %v177_v35 = vsub.f32 1.5, %v176_v20  ;;  %v172_v36 = vsel %vm730_vm2, %v665_v33, %v168_v21  ;;  %347 = vmatpush.msra.mxu1 %v336_v40  ;;  %430 = vmatpush.msrb.mxu3 %v336_v40 }
 0x112   :  { %v214_v8 = vmul.f32 %v152_v5, %v605_v43  ;;  %v206_v12 = vmul.f32 0.5, %v205_v6  ;;  %v216_v44 = vmul.f32 %v172_v36, %v603_v42  ;;  %v334_v42 = vld [vmem:[%s866_s5 + $0x50] sm:$0xff]  ;;  %429 = vmatpush.msra.mxu2 %v336_v40  ;;  %v327_v6 = vld [vmem:[%s866_s5 + $0x18] sm:$0xff] }
 0x113   :  { %v196_v13 = vmul.f32 0.5, %v195_v7  ;;  %v178_v48 = vmul.f32 %v689_v55, %v177_v35  ;;  %348 = vmatpush.msra.mxu1 %v335_v47  ;;  %432 = vmatpush.msrb.mxu3 %v335_v47 }
 0x114   :  { %v225_v15 = vmul.f32 %v678_v45, %v214_v8  ;;  %v207_v17 = vsub.f32 1.5, %v206_v12  ;;  %v723_v43 = vpop.eup %479  ;;  %431 = vmatpush.msra.mxu2 %v335_v47 }
 0x115   :  { %v197_v14 = vsub.f32 1.5, %v196_v13  ;;  %v184_v24 = vmul.f32 %v723_v43, %v694_v29  ;;  %v182_v54 = vsel %vm778_vm7, %v689_v55, %v178_v48  ;;  %349 = vmatpush.msra.mxu1 %v334_v42  ;;  %434 = vmatpush.msrb.mxu3 %v334_v42  ;;  %vm190_vm9 = vweird.f32 %v723_v43  ;;  %v331_v55 = vld [vmem:[%s866_s5 + $0x38] sm:$0xff] }
 0x116   :  { %v236_v18 = vadd.f32 %v685_v51, %v225_v15  ;;  %v208_v26 = vmul.f32 %v696_v60, %v207_v17  ;;  %433 = vmatpush.msra.mxu2 %v334_v42  ;;  %v217_v62 = vmul.f32 %v182_v54, %v601_v41  ;;  %vm807_vm10 = vmor %vm189_vm8, %vm190_vm9  ;;  %v330_v41 = vld [vmem:[%s866_s5 + $0x30] sm:$0xff] }
 0x117   :  { %v198_v30 = vmul.f32 %v478_v22, %v197_v14  ;;  %v185_v37 = vmul.f32 %v723_v43, %v184_v24  ;;  %350 = vmatpush.msra.mxu1 %v333_v25  ;;  %436 = vmatpush.msrb.mxu3 %v333_v25 }
 0x118   :  { %412 = vmatmul.msk.f32.gmra.mxu0 %vm37_vm0, %v236_v18  ;;  %v212_v39 = vsel %vm737_vm3, %v696_v60, %v208_v26  ;;  %v332_v60 = vld [vmem:[%s866_s5 + $0x40] sm:$0xff]  ;;  %435 = vmatpush.msra.mxu2 %v333_v25  ;;  %v228_v0 = vmul.f32 %v678_v45, %v217_v62 }
 0x119   :  { %v202_v31 = vsel %vm201_vm4, %v478_v22, %v198_v30  ;;  %v186_v49 = vmul.f32 0.5, %v185_v37  ;;  %v220_v52 = vmul.f32 %v212_v39, %v622_v56  ;;  %v227_v56 = vmul.f32 %v678_v45, %v216_v44  ;;  %351 = vmatpush.msra.mxu1 %v332_v60  ;;  %438 = vmatpush.msrb.mxu3 %v332_v60  ;;  %v462_v37 = vld [vmem:[%s867_s6] ss:$0 sm:$0xff]  ;;  %s508_s6 = smov [#allocation2]  }
 0x11a   :  { %v219_v38 = vmul.f32 %v202_v31, %v611_v46  ;;  %v237_v46 = vadd.f32 %v685_v51, %v226_v32  ;;  %437 = vmatpush.msra.mxu2 %v332_v60  ;;  %v239_v4 = vadd.f32 %v685_v51, %v228_v0  ;;  %s397_s9 = sshll.u32 %s508_s6, 4  ;;  %s398_s9 = int_to_ptr.vmem [resolvable:$true] %s397_s9 }
 0x11b   :  { %v187_v58 = vsub.f32 1.5, %v186_v49  ;;  %v231_v59 = vmul.f32 %v678_v45, %v220_v52  ;;  %v238_v61 = vadd.f32 %v685_v51, %v227_v56  ;;  %352 = vmatpush.msra.mxu1 %v331_v55  ;;  %440 = vmatpush.msrb.mxu3 %v331_v55 }
 0x11c   :  { %v230_v33 = vmul.f32 %v678_v45, %v219_v38  ;;  %439 = vmatpush.msra.mxu2 %v331_v55 }
 0x11d   :  { %v188_v22 = vmul.f32 %v723_v43, %v187_v58  ;;  %v242_v63 = vadd.f32 %v685_v51, %v231_v59  ;;  %353 = vmatpush.msra.mxu1 %v330_v41  ;;  %442 = vmatpush.msrb.mxu3 %v330_v41 }
 0x11e   :  { %v241_v50 = vadd.f32 %v685_v51, %v230_v33  ;;  %441 = vmatpush.msra.mxu2 %v330_v41 }
 0x11f   :  { %v192_v2 = vsel %vm807_vm10, %v723_v43, %v188_v22  ;;  %354 = vmatpush.msra.mxu1 %v329_v1  ;;  %444 = vmatpush.msrb.mxu3 %v329_v1 }
 0x120   :  { %413 = vmatmul.msk.f32.gmra.mxu0 %vm37_vm0, %v237_v46  ;;  %417 = vmatmul.msk.f32.vlgmr.msra.gmra.mxu3 %vm37_vm0, %v241_v50  ;;  %v218_v5 = vmul.f32 %v192_v2, %v624_v57  ;;  %v326_v57 = vld [vmem:[%s866_s5 + $0x10] sm:$0xff] }
 0x121   :  { %355 = vmatpush.msra.mxu1 %v328_v3  ;;  %443 = vmatpush.msra.mxu2 %v329_v1 }
 0x122   :  { %446 = vmatpush.msrb.mxu3 %v328_v3  ;;  %v229_v7 = vmul.f32 %v678_v45, %v218_v5  ;;  %v324_v45 = vld [vmem:[%s866_s5] sm:$0xff] }
 0x123   :  { %356 = vmatpush.msra.mxu1 %v327_v6  ;;  %445 = vmatpush.msra.mxu2 %v328_v3 }
 0x124   :  { %448 = vmatpush.msrb.mxu3 %v327_v6  ;;  %v240_v8 = vadd.f32 %v685_v51, %v229_v7  ;;  %v461_v51 = vld [vmem:[%s865_s4] ss:$0 sm:$0xff] }
 0x125   :  { %447 = vmatpush.msra.mxu2 %v327_v6  ;;  %357 = vmatpush.msra.mxu1 %v326_v57 }
 0x126   :  { %450 = vmatpush.msrb.mxu3 %v326_v57 }
 0x127   :  { %449 = vmatpush.msra.mxu2 %v326_v57  ;;  %358 = vmatpush.msra.mxu1 %v325_v9 }
 0x128   :  { %414 = vmatmul.msk.f32.gmra.mxu0 %vm37_vm0, %v238_v61  ;;  %418 = vmatmul.msk.f32.gmra.mxu3 %vm37_vm0, %v242_v63 }
 0x129   :  { %452 = vmatpush.msrb.mxu3 %v325_v9  ;;  %451 = vmatpush.msra.mxu2 %v325_v9 }
 0x12a   :  { %359 = vmatpush.msra.mxu1 %v324_v45 }
 0x12b   :  { %454 = vmatpush.msrb.mxu3 %v324_v45  ;;  %453 = vmatpush.msra.mxu2 %v324_v45 }
 0x130   :  { %415 = vmatmul.msk.f32.gmra.mxu0 %vm37_vm0, %v239_v4 }
 0x138   :  { %416 = vmatmul.msk.f32.gmra.mxu0 %vm37_vm0, %v240_v8 }
 0x18d   :  { %v292_v10 = vpop.f32.mrf.mxu0 }
 0x18e   :  { %v293_v11 = vadd.f32 %v461_v51, %v292_v10 }
 0x190   :  { %v316_v12 = vmax.f32 %v293_v11, 0.0 }
 0x192   :  { %360 = vmatmul.f32.vlgmr.msra.gmra.mxu1 %v316_v12 }
 0x195   :  { %v295_v13 = vpop.f32.mrf.mxu0 }
 0x196   :  { %v296_v15 = vadd.f32 %v461_v51, %v295_v13 }
 0x198   :  { %v317_v17 = vmax.f32 %v296_v15, 0.0 }
 0x19a   :  { %363 = vmatmul.f32.gmra.mxu1 %v317_v17 }
 0x19d   :  { %v298_v43 = vpop.f32.mrf.mxu0 }
 0x19e   :  { %v299_v14 = vadd.f32 %v461_v51, %v298_v43 }
 0x1a0   :  { %v318_v18 = vmax.f32 %v299_v14, 0.0 }
 0x1a2   :  { %366 = vmatmul.f32.gmra.mxu1 %v318_v18 }
 0x1a3   :  { %v310_v19 = vpop.f32.mrf.mxu3 }
 0x1a4   :  { %v311_v20 = vadd.f32 %v461_v51, %v310_v19 }
 0x1a5   :  { %v301_v21 = vpop.f32.mrf.mxu0 }
 0x1a6   :  { %v302_v23 = vadd.f32 %v461_v51, %v301_v21  ;;  %v322_v24 = vmax.f32 %v311_v20, 0.0 }
 0x1a8   :  { %v319_v26 = vmax.f32 %v302_v23, 0.0  ;;  %378 = vmatmul.f32.vlgmr.msrb.gmra.mxu3 %v322_v24 }
 0x1aa   :  { %369 = vmatmul.f32.vlgmr.msra.gmra.mxu2 %v319_v26 }
 0x1ab   :  { %v313_v27 = vpop.f32.mrf.mxu3 }
 0x1ac   :  { %v314_v30 = vadd.f32 %v461_v51, %v313_v27 }
 0x1ad   :  { %v304_v28 = vpop.f32.mrf.mxu0 }
 0x1ae   :  { %v305_v16 = vadd.f32 %v461_v51, %v304_v28  ;;  %v323_v31 = vmax.f32 %v314_v30, 0.0 }
 0x1b0   :  { %v320_v32 = vmax.f32 %v305_v16, 0.0  ;;  %381 = vmatmul.f32.gmra.mxu3 %v323_v31 }
 0x1b2   :  { %372 = vmatmul.f32.gmra.mxu2 %v320_v32 }
 0x1b5   :  { %v307_v34 = vpop.f32.mrf.mxu0 }
 0x1b6   :  { %v308_v35 = vadd.f32 %v461_v51, %v307_v34 }
 0x1b8   :  { %v321_v36 = vmax.f32 %v308_v35, 0.0 }
 0x1ba   :  { %375 = vmatmul.f32.gmra.mxu2 %v321_v36 }
 0x20f   :  { %v361_v38 = vpop.f32.mrf.mxu1 }
 0x210   :  { %v362_v39 = vadd.f32 %v462_v37, %v361_v38 }
 0x212   :  { %385 = vst.msk [vmem:[#allocation2] sm:$0xff] %vm37_vm0, %v362_v39 }
 0x217   :  { %v364_v40 = vpop.f32.mrf.mxu1 }
 0x218   :  { %v365_v33 = vadd.f32 %v462_v37, %v364_v40 }
 0x21a   :  { %386 = vst.msk [vmem:[#allocation2 + $0x8] sm:$0xff] %vm37_vm0, %v365_v33 }
 0x21f   :  { %v367_v46 = vpop.f32.mrf.mxu1 }
 0x220   :  { %v368_v44 = vadd.f32 %v462_v37, %v367_v46 }
 0x222   :  { %387 = vst.msk [vmem:[#allocation2 + $0x10] sm:$0xff] %vm37_vm0, %v368_v44 }
 0x22b   :  { %v379_v47 = vpop.f32.mrf.mxu3 }
 0x22c   :  { %v380_v48 = vadd.f32 %v462_v37, %v379_v47 }
 0x22d   :  { %v370_v49 = vpop.f32.mrf.mxu2 }
 0x22e   :  { %v371_v50 = vadd.f32 %v462_v37, %v370_v49  ;;  %391 = vst.msk [vmem:[#allocation2 + $0x30] sm:$0xff] %vm37_vm0, %v380_v48 }
 0x230   :  { %388 = vst.msk [vmem:[#allocation2 + $0x18] sm:$0xff] %vm37_vm0, %v371_v50 }
 0x233   :  { %v382_v52 = vpop.f32.mrf.mxu3 }
 0x234   :  { %v383_v53 = vadd.f32 %v462_v37, %v382_v52 }
 0x235   :  { %v373_v42 = vpop.f32.mrf.mxu2 }
 0x236   :  { %v374_v56 = vadd.f32 %v462_v37, %v373_v42  ;;  %392 = vst.msk [vmem:[#allocation2 + $0x38] sm:$0xff] %vm37_vm0, %v383_v53 }
 0x238   :  { %389 = vst.msk [vmem:[#allocation2 + $0x20] sm:$0xff] %vm37_vm0, %v374_v56 }
 0x23d   :  { %v376_v25 = vpop.f32.mrf.mxu2 }
 0x23e   :  { %v377_v54 = vadd.f32 %v462_v37, %v376_v25 }
 0x240   :  { %390 = vst.msk [vmem:[#allocation2 + $0x28] sm:$0xff] %vm37_vm0, %v377_v54 }
 0x241   :  { %405 = dma.vmem_to_hbm [thread:$0]  %s398_s9, 1024, %s400_s12, [#allocation3], %s509_s13, %s509_s13, %s510_s14  }
 0x242   :  { %505 = dma.done.wait [#allocation3], 1024  }
 0x243   :  { %506 = vsyncadd [#allocation3], 4294966272 }
 0x244   :  { %410 = vsyncpa [#allocation3], 1 }

</bundles_post_ra>
